<compile_context>
chip_gen: v7x
topology: tpu7x:2x2x1
jax: 0.10.0
libtpu: 0.0.40
codegen_flags: <defaults>
</compile_context>

<pallas_src>
import math
from typing import NamedTuple

import jax
import jax.numpy as jnp
from jax.experimental import pallas as pl
from jax.experimental.pallas import tpu as pltpu


# --------------------------------------------------------------------------- #
# Helpers
# --------------------------------------------------------------------------- #
def _round_up(x, m):
    return ((x + m - 1) // m) * m


def _sublane_multiple(dtype):
    # 8 for 4-byte dtypes, 16 for 2-byte, 32 for 1-byte (packed sublanes).
    return max(8, 32 // max(jnp.dtype(dtype).itemsize, 1))


def _device_kind():
    try:
        return jax.devices()[0].device_kind.lower()
    except Exception:
        return ""


def _vmem_capacity_bytes():
    """Physical VMEM per TensorCore, with conservative fallback."""
    try:
        cap = getattr(pltpu.get_tpu_info(), "vmem_capacity_bytes", None)
        if cap:
            return int(cap)
    except Exception:
        pass
    kind = _device_kind()
    if "v7" in kind or "7x" in kind:
        return 64 << 20
    if "v6" in kind or "v5" in kind:
        return 128 << 20
    return 64 << 20  # unknown chip: be conservative


def _mxu_lane_align():
    """MXU-friendly alignment: 256 on v6e/v7x (2x256x256 MXU), 128 on v5e."""
    kind = _device_kind()
    if "v6" in kind or "v7" in kind or "7x" in kind:
        return 256
    return 128


def _num_tensorcores():
    kind = _device_kind()
    if "v7" in kind or "7x" in kind:
        return 2
    return 1


def _choose_tk(emb_dim, tk_req, align):
    """tk (multiple of `align`) minimizing emb padding; prefer larger tk on ties."""
    hi = max(align, min(_round_up(emb_dim, align), _round_up(tk_req, align)))
    best_tk, best_pad = align, None
    c = align
    while c <= hi:
        pad = _round_up(emb_dim, c) - emb_dim
        if best_pad is None or pad < best_pad or (pad == best_pad and c > best_tk):
            best_tk, best_pad = c, pad
        c += align
    return best_tk


# --------------------------------------------------------------------------- #
# Kernel
# --------------------------------------------------------------------------- #
def feedforward_kernel(x_ref, w1_ref, b1_ref, w2_ref, b2_ref, o_ref, acc_ref):
    # Grid: (row_tiles, emb_tiles). emb (reduction) axis is last / "arbitrary".
    # x_ref: (tm, inp_p)        w1_ref: (inp_p, tk)  [W1^T chunk]   b1_ref: (1, tk)
    # w2_ref: (tk, inp_p) [W2^T chunk]  b2_ref: (1, inp_p)
    # o_ref: (tm, inp_p)        acc_ref: (tm, inp_p) f32 scratch
    k = pl.program_id(1)
    nk = pl.num_programs(1)
    is_first = k == 0
    is_last = k == nk - 1
    not_first = k != 0
    not_last = k != nk - 1

    x = x_ref[...]  # keep input dtype (bf16/f32); MXU accumulates in f32 below.

    # linear1 chunk: x @ W1^T[:, k_chunk]   (plain [M,K]x[K,N], no transpose)
    h = jnp.dot(x, w1_ref[...], preferred_element_type=jnp.float32)  # (tm, tk) f32
    h = jnp.maximum(h + b1_ref[...], 0.0)                            # bias + ReLU
    # dropout: eval mode == identity
    h = h.astype(x.dtype)                                            # MXU-native dtype

    # linear2 partial: h_chunk @ W2^T[k_chunk, :]
    partial = jnp.dot(h, w2_ref[...], preferred_element_type=jnp.float32)  # (tm, inp_p)

    # Fused reduction endpoints (no zero-init store, no final acc RMW round trip).
    @pl.when(is_first & not_last)
    def _():
        acc_ref[...] = partial

    @pl.when(not_first & not_last)
    def _():
        acc_ref[...] = acc_ref[...] + partial

    @pl.when(is_last & not_first)
    def _():
        o_ref[...] = (acc_ref[...] + partial + b2_ref[...]).astype(o_ref.dtype)

    @pl.when(is_last & is_first)  # single-step reduction (nk == 1)
    def _():
        o_ref[...] = (partial + b2_ref[...]).astype(o_ref.dtype)


# --------------------------------------------------------------------------- #
# Parameter preparation (one-time, hoisted out of the per-call hot path)
# --------------------------------------------------------------------------- #
class FFNParams(NamedTuple):
    w1t: jax.Array   # [inp_p, emb_p]  (K, N) layout for linear1
    b1:  jax.Array   # [1, emb_p] f32
    w2t: jax.Array   # [emb_p, inp_p]  (K, N) layout for linear2
    b2:  jax.Array   # [1, inp_p] f32
    inp_dim: int
    emb_dim: int
    inp_p: int
    emb_p: int
    tk: int


def prepare_feedforward_params(w1, b1, w2, b2, *, tk=512, compute_dtype=None):
    """Pad + transpose the PyTorch-layout parameters once (amortized).

    w1: [emb_dim, inp_dim], b1: [emb_dim], w2: [inp_dim, emb_dim], b2: [inp_dim].
    """
    emb_dim, inp_dim = w1.shape
    align = _mxu_lane_align()
    inp_p = _round_up(inp_dim, align)
    tk_eff = _choose_tk(emb_dim, tk, align)
    emb_p = _round_up(emb_dim, tk_eff)

    w1t = jnp.asarray(w1).T                  # [inp, emb]
    w2t = jnp.asarray(w2).T                  # [emb, inp]
    if compute_dtype is not None:
        w1t = w1t.astype(compute_dtype)
        w2t = w2t.astype(compute_dtype)
    if (inp_p, emb_p) != (inp_dim, emb_dim):
        w1t = jnp.pad(w1t, ((0, inp_p - inp_dim), (0, emb_p - emb_dim)))
        w2t = jnp.pad(w2t, ((0, emb_p - emb_dim), (0, inp_p - inp_dim)))
    b1p = jnp.pad(jnp.asarray(b1, jnp.float32), (0, emb_p - emb_dim)).reshape(1, emb_p)
    b2p = jnp.pad(jnp.asarray(b2, jnp.float32), (0, inp_p - inp_dim)).reshape(1, inp_p)
    return FFNParams(w1t, b1p, w2t, b2p, inp_dim, emb_dim, inp_p, emb_p, tk_eff)


# --------------------------------------------------------------------------- #
# Hot-path apply
# --------------------------------------------------------------------------- #
def feedforward_apply(params: FFNParams, x, *, tm=1024, compute_dtype=None):
    """Eval-mode forward: relu(x @ W1^T + b1) @ W2^T + b2."""
    batch_shape = x.shape[:-1]
    assert x.shape[-1] == params.inp_dim
    n = int(math.prod(batch_shape)) if batch_shape else 1

    xd = x.astype(compute_dtype) if compute_dtype is not None else x
    x_bytes = jnp.dtype(xd.dtype).itemsize
    out_bytes = jnp.dtype(x.dtype).itemsize
    w_bytes = jnp.dtype(params.w1t.dtype).itemsize
    sub = _sublane_multiple(xd.dtype)

    inp_p, emb_p = params.inp_p, params.emb_p
    inp_dim = params.inp_dim

    # ---- VMEM-budgeted tile selection --------------------------------------
    phys_vmem = _vmem_capacity_bytes()
    budget = min(int(phys_vmem * 0.8), 112 << 20)      # headroom below physical

    n_rows = _round_up(n, sub)
    tm_req = min(_round_up(tm, sub), n_rows)

    tk_eff = params.tk
    while True:
        # bytes independent of tm: double-buffered W1/W2 chunks + biases
        fixed = 2 * (inp_p * tk_eff + tk_eff * inp_p) * w_bytes \
                + 2 * 8 * (tk_eff + inp_p) * 4
        # per-row bytes: x + out tiles (double-buffered) + f32 accumulator
        per_row = inp_p * (2 * x_bytes + 2 * out_bytes + 4)
        avail = max(budget - fixed - (2 << 20), per_row * sub)
        tm_budget = max(sub, (avail // per_row) // sub * sub)
        if tm_budget >= tm_req:
            break
        # Weights crowd out row tiles (e.g. v7x, huge inp_dim): shrink tk instead
        # of shrinking tm below the bandwidth break-even, while emb_p stays divisible.
        half = tk_eff // 2
        if half < 128 or half % 128 != 0 or emb_p % half != 0:
            break
        tk_eff = half

    tm_eff = min(tm_req, tm_budget)

    # Make sure >= 2 row tiles exist on 2-TensorCore chips (v7x) so the
    # "parallel" axis actually shards across both cores.
    if _num_tensorcores() >= 2 and n_rows <= tm_eff and n > sub:
        tm_eff = max(sub, _round_up((n + 1) // 2, sub))

    n_p = _round_up(n, tm_eff)
    grid = (n_p // tm_eff, emb_p // tk_eff)

    fixed = 2 * (inp_p * tk_eff + tk_eff * inp_p) * w_bytes + 2 * 8 * (tk_eff + inp_p) * 4
    per_row = inp_p * (2 * x_bytes + 2 * out_bytes + 4)
    vmem_need = fixed + per_row * tm_eff
    vmem_limit = int(min(budget, max(32 << 20, vmem_need + (2 << 20))))

    # ---- per-call input padding (weights already prepared) -----------------
    x2d = xd.reshape(n, inp_dim)
    if (n_p, inp_p) != (n, inp_dim):
        x2d = jnp.pad(x2d, ((0, n_p - n), (0, inp_p - inp_dim)))

    out2d = pl.pallas_call(
        feedforward_kernel,
        out_shape=jax.ShapeDtypeStruct((n_p, inp_p), x.dtype),
        grid_spec=pltpu.PrefetchScalarGridSpec(
            num_scalar_prefetch=0,
            grid=grid,
            in_specs=[
                pl.BlockSpec((tm_eff, inp_p), lambda i, k: (i, 0)),    # x row tile
                pl.BlockSpec((inp_p, tk_eff), lambda i, k: (0, k)),    # W1^T chunk
                pl.BlockSpec((1, tk_eff), lambda i, k: (0, k)),        # b1 chunk
                pl.BlockSpec((tk_eff, inp_p), lambda i, k: (k, 0)),    # W2^T chunk
                pl.BlockSpec((1, inp_p), lambda i, k: (0, 0)),         # b2 (constant)
            ],
            out_specs=pl.BlockSpec((tm_eff, inp_p), lambda i, k: (i, 0)),
            scratch_shapes=[pltpu.VMEM((tm_eff, inp_p), jnp.float32)],
        ),
        compiler_params=pltpu.CompilerParams(
            dimension_semantics=("parallel", "arbitrary"),
            vmem_limit_bytes=vmem_limit),
    )(x2d, params.w1t, params.b1, params.w2t, params.b2)

    return out2d[:n, :inp_dim].reshape(*batch_shape, inp_dim)


def feedforward(x, w1, b1, w2, b2, *, tm=1024, tk=512, compute_dtype=None):
    """Convenience wrapper; prefer prepare_feedforward_params + feedforward_apply
    to amortize weight padding/transposition across calls."""
    params = prepare_feedforward_params(w1, b1, w2, b2, tk=tk, compute_dtype=compute_dtype)
    return feedforward_apply(params, x, tm=tm, compute_dtype=compute_dtype)


# --------------------------------------------------------------------------- #
# Test
# --------------------------------------------------------------------------- #
if __name__ == "__main__":
    batch, seq = 2, 8
    inp_dim, emb_dim = 32, 64

    key = jax.random.PRNGKey(0)
    kx, kw1, kb1, kw2, kb2 = jax.random.split(key, 5)

    x = jax.random.normal(kx, (batch, seq, inp_dim), dtype=jnp.float32)

    # Deterministic param init (nn.Linear shapes: weight [out, in], bias [out]).
    bound1 = 1.0 / (inp_dim ** 0.5)
    w1 = jax.random.uniform(kw1, (emb_dim, inp_dim), minval=-bound1, maxval=bound1)
    b1 = jax.random.uniform(kb1, (emb_dim,), minval=-bound1, maxval=bound1)
    bound2 = 1.0 / (emb_dim ** 0.5)
    w2 = jax.random.uniform(kw2, (inp_dim, emb_dim), minval=-bound2, maxval=bound2)
    b2 = jax.random.uniform(kb2, (inp_dim,), minval=-bound2, maxval=bound2)

    # One-time parameter preparation (hoisted out of the hot path), then apply.
    params = prepare_feedforward_params(w1, b1, w2, b2)
    out = feedforward_apply(params, x)
    out = jax.block_until_ready(out)

    # Reference check in plain JAX (eval-mode forward).
    ref = jnp.maximum(x @ w1.T + b1, 0.0) @ w2.T + b2
    assert out.shape == (batch, seq, inp_dim)
    assert jnp.allclose(out, ref, atol=1e-4, rtol=1e-4)

    print("KERNEL_OK")
</pallas_src>

<mosaic_0001>
module attributes {stable_mosaic.version = 11 : i64} {
  func.func @feedforward_kernel(%arg0: i32, %arg1: i32, %arg2: memref<16x128xf32, #tpu.memory_space<vmem>>, %arg3: memref<128x128xf32, #tpu.memory_space<vmem>>, %arg4: memref<1x128xf32, #tpu.memory_space<vmem>>, %arg5: memref<128x128xf32, #tpu.memory_space<vmem>>, %arg6: memref<1x128xf32, #tpu.memory_space<vmem>>, %arg7: memref<16x128xf32, #tpu.memory_space<vmem>>, %arg8: memref<16x128xf32, #tpu.memory_space<vmem>>) attributes {dimension_semantics = [#tpu.dimension_semantics<parallel>, #tpu.dimension_semantics<arbitrary>], iteration_bounds = array<i64: 1, 1>, scalar_prefetch = 0 : i64, scratch_operands = 1 : i64, tpu.core_type = #tpu.core_type<tc>, window_params = [{transform_indices = @transform_0, window_bounds = array<i64: 16, 128>}, {transform_indices = @transform_1, window_bounds = array<i64: 128, 128>}, {transform_indices = @transform_2, window_bounds = array<i64: 1, 128>}, {transform_indices = @transform_3, window_bounds = array<i64: 128, 128>}, {pipeline_mode = #tpu.pipeline_mode<synchronous>, transform_indices = @transform_4, window_bounds = array<i64: 1, 128>}, {transform_indices = @transform_5, window_bounds = array<i64: 16, 128>}]} {
    %c0_i32 = arith.constant 0 : i32
    %0 = arith.cmpi eq, %arg1, %c0_i32 : i32
    %c0_i32_0 = arith.constant 0 : i32
    %1 = arith.cmpi eq, %arg1, %c0_i32_0 : i32
    %c0_i32_1 = arith.constant 0 : i32
    %2 = arith.cmpi ne, %arg1, %c0_i32_1 : i32
    %c0_i32_2 = arith.constant 0 : i32
    %3 = arith.cmpi ne, %arg1, %c0_i32_2 : i32
    %c0 = arith.constant 0 : index
    %c0_3 = arith.constant 0 : index
    %4 = vector.load %arg2[%c0, %c0_3] : memref<16x128xf32, #tpu.memory_space<vmem>>, vector<16x128xf32>
    %c0_4 = arith.constant 0 : index
    %c0_5 = arith.constant 0 : index
    %5 = vector.load %arg3[%c0_4, %c0_5] : memref<128x128xf32, #tpu.memory_space<vmem>>, vector<128x128xf32>
    %cst = arith.constant dense<0.000000e+00> : vector<16x128xf32>
    %6 = tpu.matmul %4, %5, %cst {dimension_numbers = #tpu.dot_dimension_numbers<[1], [0], [0], [1], [0, 0, 1, 1], [], []>} : vector<16x128xf32>, vector<128x128xf32>, vector<16x128xf32> -> vector<16x128xf32>
    %c0_6 = arith.constant 0 : index
    %c0_7 = arith.constant 0 : index
    %7 = vector.load %arg4[%c0_6, %c0_7] : memref<1x128xf32, #tpu.memory_space<vmem>>, vector<1x128xf32>
    %8 = vector.broadcast %7 : vector<1x128xf32> to vector<16x128xf32>
    %9 = arith.addf %6, %8 : vector<16x128xf32>
    %cst_8 = arith.constant 0.000000e+00 : f32
    %10 = vector.broadcast %cst_8 : f32 to vector<16x128xf32>
    %11 = arith.maximumf %9, %10 : vector<16x128xf32>
    %c0_9 = arith.constant 0 : index
    %c0_10 = arith.constant 0 : index
    %12 = vector.load %arg5[%c0_9, %c0_10] : memref<128x128xf32, #tpu.memory_space<vmem>>, vector<128x128xf32>
    %cst_11 = arith.constant dense<0.000000e+00> : vector<16x128xf32>
    %13 = tpu.matmul %11, %12, %cst_11 {dimension_numbers = #tpu.dot_dimension_numbers<[1], [0], [0], [1], [0, 0, 1, 1], [], []>} : vector<16x128xf32>, vector<128x128xf32>, vector<16x128xf32> -> vector<16x128xf32>
    %14 = arith.andi %0, %3 : i1
    %15 = arith.extui %14 : i1 to i32
    %c0_i32_12 = arith.constant 0 : i32
    %16 = arith.cmpi ne, %15, %c0_i32_12 : i32
    scf.if %16 {
      %c0_16 = arith.constant 0 : index
      %c0_17 = arith.constant 0 : index
      %26 = vector.load %arg8[%c0_16, %c0_17] : memref<16x128xf32, #tpu.memory_space<vmem>>, vector<16x128xf32>
      tpu.vector_store %arg8[%c0_16, %c0_17], %13 {strides = array<i32>} : memref<16x128xf32, #tpu.memory_space<vmem>>, vector<16x128xf32>,
    } else {
    }
    %17 = arith.andi %2, %3 : i1
    %18 = arith.extui %17 : i1 to i32
    %c0_i32_13 = arith.constant 0 : i32
    %19 = arith.cmpi ne, %18, %c0_i32_13 : i32
    scf.if %19 {
      %c0_16 = arith.constant 0 : index
      %c0_17 = arith.constant 0 : index
      %26 = vector.load %arg8[%c0_16, %c0_17] : memref<16x128xf32, #tpu.memory_space<vmem>>, vector<16x128xf32>
      %27 = arith.addf %26, %13 : vector<16x128xf32>
      %c0_18 = arith.constant 0 : index
      %c0_19 = arith.constant 0 : index
      %28 = vector.load %arg8[%c0_18, %c0_19] : memref<16x128xf32, #tpu.memory_space<vmem>>, vector<16x128xf32>
      tpu.vector_store %arg8[%c0_18, %c0_19], %27 {strides = array<i32>} : memref<16x128xf32, #tpu.memory_space<vmem>>, vector<16x128xf32>,
    } else {
    }
    %20 = arith.andi %1, %2 : i1
    %21 = arith.extui %20 : i1 to i32
    %c0_i32_14 = arith.constant 0 : i32
    %22 = arith.cmpi ne, %21, %c0_i32_14 : i32
    scf.if %22 {
      %c0_16 = arith.constant 0 : index
      %c0_17 = arith.constant 0 : index
      %26 = vector.load %arg8[%c0_16, %c0_17] : memref<16x128xf32, #tpu.memory_space<vmem>>, vector<16x128xf32>
      %27 = arith.addf %26, %13 : vector<16x128xf32>
      %c0_18 = arith.constant 0 : index
      %c0_19 = arith.constant 0 : index
      %28 = vector.load %arg6[%c0_18, %c0_19] : memref<1x128xf32, #tpu.memory_space<vmem>>, vector<1x128xf32>
      %29 = vector.broadcast %28 : vector<1x128xf32> to vector<16x128xf32>
      %30 = arith.addf %27, %29 : vector<16x128xf32>
      %c0_20 = arith.constant 0 : index
      %c0_21 = arith.constant 0 : index
      %31 = vector.load %arg7[%c0_20, %c0_21] : memref<16x128xf32, #tpu.memory_space<vmem>>, vector<16x128xf32>
      tpu.vector_store %arg7[%c0_20, %c0_21], %30 {strides = array<i32>} : memref<16x128xf32, #tpu.memory_space<vmem>>, vector<16x128xf32>,
    } else {
    }
    %23 = arith.andi %1, %0 : i1
    %24 = arith.extui %23 : i1 to i32
    %c0_i32_15 = arith.constant 0 : i32
    %25 = arith.cmpi ne, %24, %c0_i32_15 : i32
    scf.if %25 {
      %c0_16 = arith.constant 0 : index
      %c0_17 = arith.constant 0 : index
      %26 = vector.load %arg6[%c0_16, %c0_17] : memref<1x128xf32, #tpu.memory_space<vmem>>, vector<1x128xf32>
      %27 = vector.broadcast %26 : vector<1x128xf32> to vector<16x128xf32>
      %28 = arith.addf %13, %27 : vector<16x128xf32>
      %c0_18 = arith.constant 0 : index
      %c0_19 = arith.constant 0 : index
      %29 = vector.load %arg7[%c0_18, %c0_19] : memref<16x128xf32, #tpu.memory_space<vmem>>, vector<16x128xf32>
      tpu.vector_store %arg7[%c0_18, %c0_19], %28 {strides = array<i32>} : memref<16x128xf32, #tpu.memory_space<vmem>>, vector<16x128xf32>,
    } else {
    }
    return
  }
  func.func @transform_0(%arg0: i32, %arg1: i32) -> (i32, i32) {
    %c0_i32 = arith.constant 0 : i32
    %c0_i32_0 = arith.constant 0 : i32
    return %arg0, %c0_i32 : i32, i32
  }
  func.func @transform_1(%arg0: i32, %arg1: i32) -> (i32, i32) {
    %c0_i32 = arith.constant 0 : i32
    %c0_i32_0 = arith.constant 0 : i32
    return %c0_i32, %arg1 : i32, i32
  }
  func.func @transform_2(%arg0: i32, %arg1: i32) -> (i32, i32) {
    %c0_i32 = arith.constant 0 : i32
    %c0_i32_0 = arith.constant 0 : i32
    return %c0_i32, %arg1 : i32, i32
  }
  func.func @transform_3(%arg0: i32, %arg1: i32) -> (i32, i32) {
    %c0_i32 = arith.constant 0 : i32
    %c0_i32_0 = arith.constant 0 : i32
    return %arg1, %c0_i32 : i32, i32
  }
  func.func @transform_4(%arg0: i32, %arg1: i32) -> (i32, i32) {
    %c0_i32 = arith.constant 0 : i32
    %c0_i32_0 = arith.constant 0 : i32
    %c0_i32_1 = arith.constant 0 : i32
    return %c0_i32, %c0_i32_0 : i32, i32
  }
  func.func @transform_5(%arg0: i32, %arg1: i32) -> (i32, i32) {
    %c0_i32 = arith.constant 0 : i32
    %c0_i32_0 = arith.constant 0 : i32
    return %arg0, %c0_i32 : i32, i32
  }
}

</mosaic_0001>

<bundles_post_ra>
// kernel: tpu_custom_call.1
= control target key start
LH: loop header
LB: loop body
LE: loop exit
PB: predicated region body
PF: predicated region fallthrough
CT: control target
= control target key end

     0   :  { %10 = vsyncpa [#allocation4], 0  ;;  %s703_s0 = inlined_call_operand.hbm [shape: f32[16,128], index: 0, kind: input, shape index: {}]   ;;  %s704_s1 = inlined_call_operand.hbm [shape: f32[128,128], index: 1, kind: input, shape index: {}]   ;;  %s705_s2 = inlined_call_operand.vmem [shape: f32[1,128], index: 2, kind: input, shape index: {}]   ;;  %s706_s3 = inlined_call_operand.hbm [shape: f32[128,128], index: 3, kind: input, shape index: {}]   ;;  %s707_s4 = inlined_call_operand.vmem [shape: f32[1,128], index: 4, kind: input, shape index: {}]   ;;  %s708_s5 = inlined_call_operand.hbm [shape: f32[16,128], index: 5, kind: output, shape index: {}]  }
   0x1   :  { %11 = vsyncpa [#allocation7], 0 }
   0x2   :  { %12 = vsyncpa [#allocation5], 0  ;;  %s594_s18 = smov [#allocation6]   ;;  %s595_s20 = smov [#allocation3]  }
   0x3   :  { %s30_s19 = sshll.u32 %s594_s18, 4  ;;  %s18_s21 = sshll.u32 %s595_s20, 4  ;;  %s31_s19 = int_to_ptr.vmem [resolvable:$true] %s30_s19  ;;  %s630_s21 = int_to_ptr.vmem [resolvable:$true] %s18_s21 }
   0x4   :  { %s500_s24 = scalar_lea.hbm %s704_s1, 2048 }
   0x5   :  { %p501_p0 = scmp.ne.s32.totalorder %s704_s1, %s500_s24  ;;  %p504_p1 = scmp.lt.u32.totalorder %s500_s24, %s704_s1 }
   0x7   :  { %p506_p2 = pnand %p504_p1, %p501_p0 }
   0x9   :  { %509 = shalt.err (!%p506_p2)
}
   0xa   :  { %s510_s29 = scalar_lea.vmem %s31_s19, 2048  ;;  %p515_p4 = scmp.lt.s32.totalorder %s31_s19, %s31_s19 }
   0xb   :  { %p511_p3 = scmp.ne.s32.totalorder %s31_s19, %s510_s29  ;;  %p516_p5 = scmp.lt.s32.totalorder %s510_s29, %s510_s29 }
   0xd   :  { %p517_p6 = por %p516_p5, %p515_p4 }
   0xf   :  { %p518_p7 = pnand %p517_p6, %p511_p3 }
  0x11   :  { %521 = shalt.err (!%p518_p7)
}
  0x12   :  { %s596_s30 = smov 128   ;;  %s597_s6 = smov 8  }
  0x13   :  { %36 = dma.hbm_to_vmem [thread:$0]  %s704_s1, 2048, %s31_s19, [#allocation7], %s596_s30, %s596_s30, %s597_s6  }
  0x14   :  { %s522_s11 = scalar_lea.hbm %s703_s0, 256 }
  0x15   :  { %p523_p8 = scmp.ne.s32.totalorder %s703_s0, %s522_s11  ;;  %p526_p9 = scmp.lt.u32.totalorder %s522_s11, %s703_s0 }
  0x17   :  { %p528_p10 = pnand %p526_p9, %p523_p8 }
  0x19   :  { %531 = shalt.err (!%p528_p10)
}
  0x1a   :  { %s532_s16 = scalar_lea.vmem %s630_s21, 256  ;;  %p537_p12 = scmp.lt.s32.totalorder %s630_s21, %s630_s21 }
  0x1b   :  { %p533_p11 = scmp.ne.s32.totalorder %s630_s21, %s532_s16  ;;  %p538_p13 = scmp.lt.s32.totalorder %s532_s16, %s532_s16 }
  0x1d   :  { %p539_p0 = por %p538_p13, %p537_p12 }
  0x1f   :  { %p540_p1 = pnand %p539_p0, %p533_p11 }
  0x21   :  { %543 = shalt.err (!%p540_p1)
}
  0x22   :  { %24 = dma.hbm_to_vmem [thread:$0]  %s703_s0, 256, %s630_s21, [#allocation4], %s596_s30, %s596_s30, %s597_s6  }
  0x23   :  { %s598_s18 = smov [#allocation8]   ;;  %s544_s23 = scalar_lea.hbm %s706_s3, 2048 }
  0x24   :  { %s44_s19 = sshll.u32 %s598_s18, 4  ;;  %p545_p2 = scmp.ne.s32.totalorder %s706_s3, %s544_s23  ;;  %s45_s19 = int_to_ptr.vmem [resolvable:$true] %s44_s19 }
  0x25   :  { %p548_p3 = scmp.lt.u32.totalorder %s544_s23, %s706_s3 }
  0x27   :  { %p550_p4 = pnand %p548_p3, %p545_p2 }
  0x29   :  { %553 = shalt.err (!%p550_p4)
}
  0x2a   :  { %s554_s28 = scalar_lea.vmem %s45_s19, 2048  ;;  %p559_p6 = scmp.lt.s32.totalorder %s45_s19, %s45_s19 }
  0x2b   :  { %p555_p5 = scmp.ne.s32.totalorder %s45_s19, %s554_s28  ;;  %p560_p7 = scmp.lt.s32.totalorder %s554_s28, %s554_s28 }
  0x2d   :  { %p561_p8 = por %p560_p7, %p559_p6 }
  0x2f   :  { %p562_p9 = pnand %p561_p8, %p555_p5 }
  0x31   :  { %565 = shalt.err (!%p562_p9)
}
  0x32   :  { %50 = dma.hbm_to_vmem [thread:$0]  %s706_s3, 2048, %s45_s19, [#allocation7], %s596_s30, %s596_s30, %s597_s6  }
  0x33   :  { %588 = dma.done.wait [#allocation4], 256  }
  0x34   :  { %589 = vsyncadd [#allocation4], 4294967040 }
  0x35   :  { %590 = dma.done.wait [#allocation7], 4096  }
  0x36   :  { %591 = vsyncadd [#allocation7], 4294963200  ;;  %v66_v0 = vld [vmem:[#allocation6] sm:$0xff]  ;;  %v67_v1 = vld [vmem:[#allocation6 + $0x8] sm:$0xff]  ;;  %s599_s9 = smov [#allocation9]  }
  0x37   :  { %v68_v2 = vld [vmem:[#allocation6 + $0x10] sm:$0xff]  ;;  %v430_v3 = vpack.c.bf16 %v67_v1, %v66_v0  ;;  %v69_v4 = vld [vmem:[#allocation6 + $0x18] sm:$0xff]  ;;  %v70_v6 = vld [vmem:[#allocation6 + $0x20] sm:$0xff]  ;;  %s308_s10 = sshll.u32 %s599_s9, 4  ;;  %s309_s10 = int_to_ptr.vmem [resolvable:$true] %s308_s10 }
  0x38   :  { %v434_v5 = vpack.c.bf16 %v69_v4, %v68_v2  ;;  %v71_v7 = vld [vmem:[#allocation6 + $0x28] sm:$0xff]  ;;  %v72_v9 = vld [vmem:[#allocation6 + $0x30] sm:$0xff]  ;;  %v73_v10 = vld [vmem:[#allocation6 + $0x38] sm:$0xff]  ;;  %p571_p11 = scmp.lt.s32.totalorder %s309_s10, %s309_s10 }
  0x39   :  { %431 = vmatprep.subr.bf16.mxu0 %v430_v3  ;;  %v438_v8 = vpack.c.bf16 %v71_v7, %v70_v6  ;;  %v64_v11 = vld [vmem:[#allocation3] sm:$0xff]  ;;  %v166_v12 = vld [vmem:[#allocation8] sm:$0xff]  ;;  %v167_v13 = vld [vmem:[#allocation8 + $0x8] sm:$0xff]  ;;  %v442_v20 = vpack.c.bf16 %v73_v10, %v72_v9 }
  0x3a   :  { %433 = vmatpush3.bf16.msra.mxu0 %v430_v3  ;;  %392 = vmatprep.mubr.f32.mxu0 %v64_v11  ;;  %v168_v14 = vld [vmem:[#allocation8 + $0x10] sm:$0xff]  ;;  %v462_v15 = vpack.c.bf16 %v167_v13, %v166_v12  ;;  %v169_v16 = vld [vmem:[#allocation8 + $0x18] sm:$0xff]  ;;  %v170_v18 = vld [vmem:[#allocation8 + $0x20] sm:$0xff] }
  0x3b   :  { %435 = vmatprep.subr.bf16.mxu0 %v434_v5  ;;  %v466_v17 = vpack.c.bf16 %v169_v16, %v168_v14  ;;  %v171_v19 = vld [vmem:[#allocation8 + $0x28] sm:$0xff]  ;;  %v74_v21 = vld [vmem:[#allocation6 + $0x40] sm:$0xff]  ;;  %v172_v24 = vld [vmem:[#allocation8 + $0x30] sm:$0xff] }
  0x3c   :  { %463 = vmatprep.subr.bf16.mxu1 %v462_v15  ;;  %v75_v22 = vld [vmem:[#allocation6 + $0x48] sm:$0xff]  ;;  %v470_v23 = vpack.c.bf16 %v171_v19, %v170_v18  ;;  %v173_v25 = vld [vmem:[#allocation8 + $0x38] sm:$0xff]  ;;  %v76_v27 = vld [vmem:[#allocation6 + $0x50] sm:$0xff] }
  0x3d   :  { %465 = vmatpush3.bf16.msra.mxu1 %v462_v15  ;;  %v446_v26 = vpack.c.bf16 %v75_v22, %v74_v21  ;;  %v77_v28 = vld [vmem:[#allocation6 + $0x58] sm:$0xff]  ;;  %v474_v29 = vpack.c.bf16 %v173_v25, %v172_v24  ;;  %v174_v30 = vld [vmem:[#allocation8 + $0x40] sm:$0xff]  ;;  %v175_v31 = vld [vmem:[#allocation8 + $0x48] sm:$0xff] }
  0x3e   :  { %437 = vmatpush3.bf16.msra.mxu0 %v434_v5  ;;  %467 = vmatprep.subr.bf16.mxu1 %v466_v17  ;;  %v450_v32 = vpack.c.bf16 %v77_v28, %v76_v27  ;;  %v78_v33 = vld [vmem:[#allocation6 + $0x60] sm:$0xff]  ;;  %v79_v34 = vld [vmem:[#allocation6 + $0x68] sm:$0xff]  ;;  %v478_v35 = vpack.c.bf16 %v175_v31, %v174_v30  ;;  %v176_v36 = vld [vmem:[#allocation8 + $0x50] sm:$0xff] }
  0x3f   :  { %439 = vmatprep.subr.bf16.mxu0 %v438_v8  ;;  %v177_v37 = vld [vmem:[#allocation8 + $0x58] sm:$0xff]  ;;  %v454_v38 = vpack.c.bf16 %v79_v34, %v78_v33  ;;  %v80_v39 = vld [vmem:[#allocation6 + $0x70] sm:$0xff]  ;;  %v178_v42 = vld [vmem:[#allocation8 + $0x60] sm:$0xff] }
  0x40   :  { %v81_v40 = vld [vmem:[#allocation6 + $0x78] sm:$0xff]  ;;  %v482_v41 = vpack.c.bf16 %v177_v37, %v176_v36  ;;  %v179_v43 = vld [vmem:[#allocation8 + $0x68] sm:$0xff]  ;;  %v180_v47 = vld [vmem:[#allocation8 + $0x70] sm:$0xff] }
  0x41   :  { %469 = vmatpush3.bf16.msra.mxu1 %v466_v17  ;;  %v458_v44 = vpack.c.bf16 %v81_v40, %v80_v39  ;;  %v486_v45 = vpack.c.bf16 %v179_v43, %v178_v42  ;;  %v65_v46 = vld [vmem:[#allocation3 + $0x8] sm:$0xff]  ;;  %v321_v50 = vld [vmem:[%s705_s2] ss:$0 sm:$0xff]  ;;  %s566_s2 = scalar_lea.vmem %s309_s10, 256 }
  0x42   :  { %441 = vmatpush3.bf16.msra.mxu0 %v438_v8  ;;  %471 = vmatprep.subr.bf16.mxu1 %v470_v23  ;;  %v181_v48 = vld [vmem:[#allocation8 + $0x78] sm:$0xff]  ;;  %v323_v57 = vld [vmem:[%s707_s4] ss:$0 sm:$0xff]  ;;  %p567_p10 = scmp.ne.s32.totalorder %s309_s10, %s566_s2  ;;  %p572_p12 = scmp.lt.s32.totalorder %s566_s2, %s566_s2 }
  0x43   :  { %443 = vmatprep.subr.bf16.mxu0 %v442_v20  ;;  %v490_v49 = vpack.c.bf16 %v181_v48, %v180_v47 }
  0x44   :  { %p573_p13 = por %p572_p12, %p571_p11 }
  0x45   :  { %473 = vmatpush3.bf16.msra.mxu1 %v470_v23 }
  0x46   :  { %445 = vmatpush3.bf16.msra.mxu0 %v442_v20  ;;  %475 = vmatprep.subr.bf16.mxu1 %v474_v29  ;;  %p574_p0 = pnand %p573_p13, %p567_p10 }
  0x47   :  { %447 = vmatprep.subr.bf16.mxu0 %v446_v26 }
  0x49   :  { %477 = vmatpush3.bf16.msra.mxu1 %v474_v29 }
  0x4a   :  { %449 = vmatpush3.bf16.msra.mxu0 %v446_v26  ;;  %479 = vmatprep.subr.bf16.mxu1 %v478_v35 }
  0x4b   :  { %451 = vmatprep.subr.bf16.mxu0 %v450_v32 }
  0x4d   :  { %481 = vmatpush3.bf16.msra.mxu1 %v478_v35 }
  0x4e   :  { %453 = vmatpush3.bf16.msra.mxu0 %v450_v32  ;;  %483 = vmatprep.subr.bf16.mxu1 %v482_v41 }
  0x4f   :  { %455 = vmatprep.subr.bf16.mxu0 %v454_v38 }
  0x51   :  { %485 = vmatpush3.bf16.msra.mxu1 %v482_v41 }
  0x52   :  { %457 = vmatpush3.bf16.msra.mxu0 %v454_v38  ;;  %487 = vmatprep.subr.bf16.mxu1 %v486_v45 }
  0x53   :  { %459 = vmatprep.subr.bf16.mxu0 %v458_v44 }
  0x55   :  { %489 = vmatpush3.bf16.msra.mxu1 %v486_v45 }
  0x56   :  { %461 = vmatpush3.bf16.msra.mxu0 %v458_v44  ;;  %491 = vmatprep.subr.bf16.mxu1 %v490_v49 }
  0x59   :  { %393 = vmatmul.mubr.f32.vlgmr.msra.gmra.mrb[0].mxu0 %v65_v46  ;;  %493 = vmatpush3.bf16.msra.mxu1 %v490_v49 }
 0x12c   :  { %v394_v51 = vpop.f32.mrb[0].mxu0 }
 0x12d   :  { %v161_v52 = vadd.f32 %v394_v51, %v321_v50  ;;  %v155_v53 = vpop.f32.mrb[1].mxu0 }
 0x12e   :  { %v156_v54 = vadd.f32 %v321_v50, %v155_v53 }
 0x12f   :  { %v165_v56 = vmax.f32 %v161_v52, 0.0 }
 0x130   :  { %v164_v55 = vmax.f32 %v156_v54, 0.0 }
 0x132   :  { %427 = vmatprep.mubr.f32.mxu1 %v164_v55 }
 0x133   :  { %428 = vmatmul.mubr.f32.vlgmr.msra.gmra.mrb[0].mxu1 %v165_v56 }
 0x206   :  { %v429_v58 = vpop.f32.mrb[0].mxu1 }
 0x207   :  { %v300_v59 = vadd.f32 %v429_v58, %v323_v57  ;;  %v248_v60 = vpop.f32.mrb[1].mxu1 }
 0x208   :  { %v299_v61 = vadd.f32 %v323_v57, %v248_v60 }
 0x209   :  { %302 = vst [vmem:[#allocation9 + $0x8] sm:$0xff] %v300_v59 }
 0x20a   :  { %301 = vst [vmem:[#allocation9] sm:$0xff] %v299_v61 }
 0x20b   :  { %577 = shalt.err (!%p574_p0)
}
 0x20c   :  { %s578_s4 = scalar_lea.hbm %s708_s5, 256 }
 0x20d   :  { %p579_p1 = scmp.ne.s32.totalorder %s708_s5, %s578_s4  ;;  %p582_p2 = scmp.lt.u32.totalorder %s578_s4, %s708_s5 }
 0x20f   :  { %p584_p3 = pnand %p582_p2, %p579_p1 }
 0x211   :  { %587 = shalt.err (!%p584_p3)
}
 0x212   :  { %314 = dma.vmem_to_hbm [thread:$0]  %s309_s10, 256, %s708_s5, [#allocation5], %s596_s30, %s596_s30, %s597_s6  }
 0x213   :  { %592 = dma.done.wait [#allocation5], 256  }
 0x214   :  { %593 = vsyncadd [#allocation5], 4294967040 }
 0x215   :  { %318 = vsyncpa [#allocation4], 1 }
 0x216   :  { %319 = vsyncpa [#allocation7], 1 }
 0x217   :  { %320 = vsyncpa [#allocation5], 1 }

</bundles_post_ra>
